<compile_context>
chip_gen: v6e
topology: v6e:2x2x1
jax: 0.10.0
libtpu: 0.0.40
codegen_flags: <defaults>
</compile_context>

<pallas_src>
import functools

import jax
import jax.numpy as jnp
from jax.experimental import pallas as pl
from jax.experimental.pallas import tpu as pltpu

# Left zero-pad (columns) inside padded VMEM slabs: keeps the interior store sublane-
# aligned (offset 8); only column _LPAD-1 is logically needed by the conv halo.
_LPAD = 8


@functools.lru_cache(maxsize=None)
def _vmem_limit():
    # ~70% of physical VMEM (v5e/v6e: 128 MiB, v7x: 64 MiB per TC); conservative fallback.
    try:
        cap = int(pltpu.get_tpu_info().vmem_capacity_bytes)
    except Exception:
        cap = 64 * 1024 * 1024
    return max(32 * 1024 * 1024, min(int(cap * 0.7), 96 * 1024 * 1024))


def _cparams(n_axes):
    return pltpu.CompilerParams(
        dimension_semantics=("parallel",) * n_axes,
        vmem_limit_bytes=_vmem_limit())


# ----------------------------------------------------------------------------
# In-kernel helpers
# ----------------------------------------------------------------------------
def _store_padded(pad_ref, val, h, w):
    """Zero a padded VMEM slab and write the (h, w, c) value into its interior.

    Zeroing the whole slab is ~1 us of pure VMEM stores and keeps the kernel safe
    under megacore grid sharding (no cross-grid-step scratch dependence)."""
    pad_ref[...] = jnp.zeros(pad_ref.shape, pad_ref.dtype)
    pad_ref[1:h + 1, _LPAD:_LPAD + w, :] = val.astype(pad_ref.dtype)


def _conv3x3_bn_relu(pad_refs, w_refs, sc_ref, sh_ref, idx, h, w):
    """3x3 conv (stride 1, pad 1) over zero-padded VMEM slabs.

    The 3 kx taps are folded into the contraction (K = 3*Cin), so each input slab costs
    3 MXU matmuls (one per ky).  Multiple slabs implement a channel-concat input via
    split-K accumulation.  Epilogue: folded BatchNorm (eval) + ReLU, in f32.
    """
    acc = None
    for pad_ref, w_ref in zip(pad_refs, w_refs):
        cin = pad_ref.shape[-1]
        for ky in range(3):
            band = pad_ref[ky:ky + h, :, :]                       # (h, Wpad, cin) aligned read
            cat = jnp.concatenate(
                [band[:, _LPAD - 1 + kx:_LPAD - 1 + kx + w, :] for kx in range(3)],
                axis=-1)                                          # (h, w, 3*cin)
            part = jnp.dot(cat.reshape(h * w, 3 * cin), w_ref[ky],
                           preferred_element_type=jnp.float32)
            acc = part if acc is None else acc + part
    sc = sc_ref[idx:idx + 1, :]                                   # hoisted BN rows
    sh = sh_ref[idx:idx + 1, :]
    y = acc * sc + sh                                             # BN (eval, folded)
    return jnp.maximum(y, 0.0)                                    # (h*w, cout) f32


# ----------------------------------------------------------------------------
# Pallas kernels
# ----------------------------------------------------------------------------
def _l2_normalize_kernel(x_ref, o_ref):
    # F.normalize(x, p=2, dim=channels): x / clamp_min(||x||_2, eps)
    x = x_ref[...]
    nrm = jnp.sqrt(jnp.sum(x * x, axis=-1, keepdims=True))
    o_ref[...] = x / jnp.maximum(nrm, 1e-12)


def _make_tripleblock_kernel(h, w, n_in):
    """Fused Tripleblock: 3x (conv3x3 + BN(eval) + ReLU), intermediates stay in VMEM.

    n_in = number of input slabs feeding the first conv (1 = encoder/latent,
    2 = decoder where [skip, upsampled] replaces the channel concat).
    """
    def kernel(*refs):
        x_refs = refs[:n_in]
        w1_refs = refs[n_in:2 * n_in]
        w2_ref, w3_ref, sc_ref, sh_ref, out_ref = refs[2 * n_in:2 * n_in + 5]
        scratch = refs[2 * n_in + 5:]
        pad_ins = scratch[:n_in]
        pad_a, pad_b = scratch[n_in], scratch[n_in + 1]
        cout = out_ref.shape[-1]

        # Stage inputs into zero-padded VMEM slabs (padding never touches HBM).
        for x_ref, pin in zip(x_refs, pad_ins):
            _store_padded(pin, x_ref[0], h, w)

        y1 = _conv3x3_bn_relu(pad_ins, w1_refs, sc_ref, sh_ref, 0, h, w)
        _store_padded(pad_a, y1.reshape(h, w, cout), h, w)

        y2 = _conv3x3_bn_relu([pad_a], [w2_ref], sc_ref, sh_ref, 1, h, w)
        _store_padded(pad_b, y2.reshape(h, w, cout), h, w)

        y3 = _conv3x3_bn_relu([pad_b], [w3_ref], sc_ref, sh_ref, 2, h, w)
        out_ref[0, :, :, :] = y3.reshape(h, w, cout).astype(out_ref.dtype)

    return kernel


def _maxpool2x2_kernel(x_ref, o_ref):
    # x_ref: (1, H, Wo, 2C) -- adjacent column pair pre-packed into lanes (free XLA reshape).
    _, ho, wo, c = o_ref.shape
    x = x_ref[0]                                         # (2*ho, wo, 2c)
    xr = x.reshape(ho, 2, wo, 2 * c)                     # leading-dim split (no relayout)
    m = jnp.maximum(xr[:, 0, :, :], xr[:, 1, :, :])      # row-pair max
    o_ref[0, :, :, :] = jnp.maximum(m[:, :, :c], m[:, :, c:])   # column-pair max


def _convt2x2_kernel(x_ref, w_ref, b_ref, o_ref):
    # ConvTranspose2d(kernel=2, stride=2): output is written lane-packed as
    # (Hh, dy, Wh, dx*C) so the wrapper's reshape to (2Hh, 2Wh, C) is a free interleave.
    _, hh, wh, cin = x_ref.shape
    cout = b_ref.shape[-1]
    xm = x_ref[0].reshape(hh * wh, cin)
    taps = [jnp.dot(xm, w_ref[t], preferred_element_type=jnp.float32) + b_ref[0:1, :]
            for t in range(4)]                           # t = 2*dy + dx
    row0 = jnp.concatenate([taps[0], taps[1]], axis=-1).reshape(hh, wh, 2 * cout)
    row1 = jnp.concatenate([taps[2], taps[3]], axis=-1).reshape(hh, wh, 2 * cout)
    o_ref[0, :, 0, :, :] = row0.astype(o_ref.dtype)
    o_ref[0, :, 1, :, :] = row1.astype(o_ref.dtype)


def _conv1x1_bias_kernel(x_ref, w_ref, b_ref, o_ref):
    _, h, w, cout = o_ref.shape
    cin = x_ref.shape[-1]
    y = jnp.dot(x_ref[0].reshape(h * w, cin), w_ref[...],
                preferred_element_type=jnp.float32) + b_ref[0:1, :]
    o_ref[0, :, :, :] = y.reshape(h, w, cout)


# ----------------------------------------------------------------------------
# pallas_call builders (cached per shape so identical layers compile once)
# ----------------------------------------------------------------------------
@functools.lru_cache(maxsize=None)
def _l2_normalize_fn(n, h, w, c):
    f = pl.pallas_call(
        _l2_normalize_kernel,
        out_shape=jax.ShapeDtypeStruct((n, h, w, c), jnp.float32),
        grid=(n,),
        in_specs=[pl.BlockSpec((1, h, w, c), lambda i: (i, 0, 0, 0))],
        out_specs=pl.BlockSpec((1, h, w, c), lambda i: (i, 0, 0, 0)),
        compiler_params=_cparams(1),
    )
    return jax.jit(f)


@functools.lru_cache(maxsize=None)
def _tripleblock_fn(n, h, w, cins, cout):
    n_in = len(cins)
    in_specs = [pl.BlockSpec((1, h, w, c), lambda i: (i, 0, 0, 0)) for c in cins]
    in_specs += [pl.BlockSpec((3, 3 * c, cout), lambda i: (0, 0, 0)) for c in cins]
    in_specs += [pl.BlockSpec((3, 3 * cout, cout), lambda i: (0, 0, 0)),   # w2
                 pl.BlockSpec((3, 3 * cout, cout), lambda i: (0, 0, 0)),   # w3
                 pl.BlockSpec((3, cout), lambda i: (0, 0)),                # bn scale
                 pl.BlockSpec((3, cout), lambda i: (0, 0))]                # bn shift
    scratch = [pltpu.VMEM((h + 2, w + 2 * _LPAD, c), jnp.bfloat16) for c in cins]
    scratch += [pltpu.VMEM((h + 2, w + 2 * _LPAD, cout), jnp.bfloat16),
                pltpu.VMEM((h + 2, w + 2 * _LPAD, cout), jnp.bfloat16)]
    f = pl.pallas_call(
        _make_tripleblock_kernel(h, w, n_in),
        out_shape=jax.ShapeDtypeStruct((n, h, w, cout), jnp.bfloat16),
        grid=(n,),
        in_specs=in_specs,
        out_specs=pl.BlockSpec((1, h, w, cout), lambda i: (i, 0, 0, 0)),
        scratch_shapes=scratch,
        compiler_params=_cparams(1),
    )
    return jax.jit(f)


@functools.lru_cache(maxsize=None)
def _maxpool2x2_fn(n, h, w, c):
    ho, wo = h // 2, w // 2
    f = pl.pallas_call(
        _maxpool2x2_kernel,
        out_shape=jax.ShapeDtypeStruct((n, ho, wo, c), jnp.bfloat16),
        grid=(n,),
        in_specs=[pl.BlockSpec((1, h, wo, 2 * c), lambda i: (i, 0, 0, 0))],
        out_specs=pl.BlockSpec((1, ho, wo, c), lambda i: (i, 0, 0, 0)),
        compiler_params=_cparams(1),
    )
    return jax.jit(f)


@functools.lru_cache(maxsize=None)
def _convt2x2_fn(n, hh, wh, cin, cout):
    f = pl.pallas_call(
        _convt2x2_kernel,
        out_shape=jax.ShapeDtypeStruct((n, hh, 2, wh, 2 * cout), jnp.bfloat16),
        grid=(n,),
        in_specs=[pl.BlockSpec((1, hh, wh, cin), lambda i: (i, 0, 0, 0)),
                  pl.BlockSpec((4, cin, cout), lambda i: (0, 0, 0)),
                  pl.BlockSpec((1, cout), lambda i: (0, 0))],
        out_specs=pl.BlockSpec((1, hh, 2, wh, 2 * cout), lambda i: (i, 0, 0, 0, 0)),
        compiler_params=_cparams(1),
    )
    return jax.jit(f)


@functools.lru_cache(maxsize=None)
def _conv1x1_fn(n, h, w, cin, cout):
    f = pl.pallas_call(
        _conv1x1_bias_kernel,
        out_shape=jax.ShapeDtypeStruct((n, h, w, cout), jnp.float32),
        grid=(n,),
        in_specs=[pl.BlockSpec((1, h, w, cin), lambda i: (i, 0, 0, 0)),
                  pl.BlockSpec((cin, cout), lambda i: (0, 0)),
                  pl.BlockSpec((1, cout), lambda i: (0, 0))],
        out_specs=pl.BlockSpec((1, h, w, cout), lambda i: (i, 0, 0, 0)),
        compiler_params=_cparams(1),
    )
    return jax.jit(f)


# ----------------------------------------------------------------------------
# Op wrappers (thin JAX glue)
# ----------------------------------------------------------------------------
def l2_normalize_channels(x):
    n, h, w, c = x.shape
    return _l2_normalize_fn(n, h, w, c)(x)


def tripleblock(xs, p):
    """xs: list of NHWC bf16 activations feeding conv1 (1 entry, or 2 = [skip, x])."""
    n, h, w, _ = xs[0].shape
    cins = tuple(int(x.shape[-1]) for x in xs)
    cout = int(p["w2"].shape[-1])
    fn = _tripleblock_fn(n, h, w, cins, cout)
    return fn(*xs, *p["w1"], p["w2"], p["w3"], p["scale"], p["shift"])


def maxpool2x2(x):
    n, h, w, c = x.shape
    # Pack adjacent column pairs into lanes; free row-major reshape in XLA.
    return _maxpool2x2_fn(n, h, w, c)(x.reshape(n, h, w // 2, 2 * c))


def conv_transpose2x2(x, p):
    n, hh, wh, cin = x.shape
    cout = int(p["b"].shape[-1])
    out = _convt2x2_fn(n, hh, wh, cin, cout)(x, p["w"], p["b"])  # (n, hh, 2, wh, 2*cout)
    # Row-major identity reshape interleaves the 2x2 taps into (2*hh, 2*wh, cout).
    return out.reshape(n, 2 * hh, 2 * wh, cout)


def conv1x1_bias(x, p):
    n, h, w, cin = x.shape
    cout = int(p["w"].shape[-1])
    return _conv1x1_fn(n, h, w, cin, cout)(x, p["w"], p["b"])


def nearest_resize(x, oh, ow):
    # F.interpolate(mode='nearest'): src_index = floor(dst_index * in/out).
    # Fast paths: integer upsample -> repeat (broadcast/reshape in XLA);
    # integer downsample -> strided slice; general case -> gather fallback.
    n, h, w, c = x.shape
    if oh == h and ow == w:
        return x

    def axis_resize(arr, axis, size_in, size_out):
        if size_out == size_in:
            return arr
        if size_out % size_in == 0:
            return jnp.repeat(arr, size_out // size_in, axis=axis)
        if size_in % size_out == 0:
            sl = [slice(None)] * arr.ndim
            sl[axis] = slice(0, size_in, size_in // size_out)
            return arr[tuple(sl)]
        idx = jnp.minimum(
            jnp.floor(jnp.arange(size_out) * (size_in / size_out)).astype(jnp.int32),
            size_in - 1)
        return jnp.take(arr, idx, axis=axis)

    x = axis_resize(x, 1, h, oh)
    x = axis_resize(x, 2, w, ow)
    return x


# ----------------------------------------------------------------------------
# Deterministic parameter construction (matches PyTorch module shapes; bf16 weights)
# ----------------------------------------------------------------------------
def _fold_bn(key, n_convs, cout):
    kg, kb, km, kv = jax.random.split(key, 4)
    gamma = 1.0 + 0.1 * jax.random.normal(kg, (n_convs, cout), jnp.float32)
    beta = 0.1 * jax.random.normal(kb, (n_convs, cout), jnp.float32)
    mean = 0.1 * jax.random.normal(km, (n_convs, cout), jnp.float32)
    var = 1.0 + 0.2 * jax.random.uniform(kv, (n_convs, cout), jnp.float32)
    scale = gamma / jnp.sqrt(var + 1e-5)                 # BN folded (inference mode)
    shift = beta - mean * scale
    return scale, shift


def _init_tripleblock(key, cins, cout):
    n_in = len(cins)
    keys = jax.random.split(key, n_in + 3)
    fan1 = 9.0 * sum(cins)
    w1 = tuple(
        (jax.random.normal(keys[i], (3, 3 * c, cout), jnp.float32) / fan1 ** 0.5
         ).astype(jnp.bfloat16)
        for i, c in enumerate(cins))
    w2 = (jax.random.normal(keys[n_in], (3, 3 * cout, cout), jnp.float32)
          / (9.0 * cout) ** 0.5).astype(jnp.bfloat16)
    w3 = (jax.random.normal(keys[n_in + 1], (3, 3 * cout, cout), jnp.float32)
          / (9.0 * cout) ** 0.5).astype(jnp.bfloat16)
    scale, shift = _fold_bn(keys[n_in + 2], 3, cout)
    return {"w1": w1, "w2": w2, "w3": w3, "scale": scale, "shift": shift}


def _init_convt(key, cin, cout):
    kw, kb = jax.random.split(key)
    w = (jax.random.normal(kw, (4, cin, cout), jnp.float32)
         / (4.0 * cin) ** 0.5).astype(jnp.bfloat16)
    b = 0.1 * jax.random.normal(kb, (1, cout), jnp.float32)
    return {"w": w, "b": b}


def _init_conv1x1(key, cin, cout):
    kw, kb = jax.random.split(key)
    w = (jax.random.normal(kw, (cin, cout), jnp.float32) / cin ** 0.5).astype(jnp.bfloat16)
    b = 0.1 * jax.random.normal(kb, (1, cout), jnp.float32)
    return {"w": w, "b": b}


def init_fcn_params(key, in_channels=3, out_channels=5, channels=(8, 16, 32, 64)):
    keys = iter(jax.random.split(key, 4 * len(channels) + 8))
    params = {"down": [], "up_ct": [], "up_tb": []}
    cin = in_channels
    for ch in channels:
        params["down"].append(_init_tripleblock(next(keys), (cin,), ch))
        cin = ch
    for ch in channels[::-1]:
        params["up_ct"].append(_init_convt(next(keys), ch * 2, ch))
        # Tripleblock(2*ch -> ch): first-conv weight pre-split over [skip, upsampled].
        params["up_tb"].append(_init_tripleblock(next(keys), (ch, ch), ch))
    params["latent"] = _init_tripleblock(next(keys), (channels[-1],), channels[-1] * 2)
    params["last"] = _init_conv1x1(next(keys), channels[0], out_channels)
    return params


# ----------------------------------------------------------------------------
# FCN forward (mirrors the PyTorch module)
# ----------------------------------------------------------------------------
def fcn_forward(params, x_nchw):
    x = jnp.transpose(x_nchw, (0, 2, 3, 1)).astype(jnp.float32)   # NCHW -> NHWC
    orig_h, orig_w = x.shape[1], x.shape[2]

    x = l2_normalize_channels(x)                     # F.normalize(x, p=2.0, dim=1)
    x = nearest_resize(x, 256, 256).astype(jnp.bfloat16)   # F.interpolate -> 256x256

    skips = []
    for blk in params["down"]:
        x = tripleblock([x], blk)
        skips.append(x)
        x = maxpool2x2(x)

    x = tripleblock([x], params["latent"])

    skips = skips[::-1]
    for i in range(len(params["up_ct"])):
        x = conv_transpose2x2(x, params["up_ct"][i])
        # Shapes always match at power-of-two sizes so torch's resize branch is dead.
        # TODO(synk): torch.nn.functional has no `resize`; that branch is unreachable.
        # torch.cat((skip, x), dim=C) is fused into the first conv via split-K.
        x = tripleblock([skips[i], x], params["up_tb"][i])

    # lastlayer (1x1 conv, pointwise) commutes with nearest-resize (pure pixel gather):
    # apply the conv at the smaller resolution to avoid redundant matmul work.
    if orig_h * orig_w <= 256 * 256:
        x = nearest_resize(x, orig_h, orig_w)        # F.interpolate(x, size=(h, w))
        x = conv1x1_bias(x, params["last"])          # lastlayer: Conv2d(ch[0], out, 1)
    else:
        x = conv1x1_bias(x, params["last"])
        x = nearest_resize(x, orig_h, orig_w)
    return jnp.transpose(x, (0, 3, 1, 2))            # NHWC -> NCHW (float32)


if __name__ == "__main__":
    key = jax.random.PRNGKey(0)
    pkey, xkey = jax.random.split(key)
    # Small instantiation: FCN(in_channels=3, out_channels=5, channels=[8, 16, 32, 64])
    params = init_fcn_params(pkey, in_channels=3, out_channels=5,
                             channels=(8, 16, 32, 64))
    x = jax.random.normal(xkey, (2, 3, 16, 16), jnp.float32)   # NCHW, like PyTorch
    fwd = jax.jit(fcn_forward)
    y = fwd(params, x)
    y = jax.block_until_ready(y)
    assert y.shape == (2, 5, 16, 16), y.shape
    assert bool(jnp.all(jnp.isfinite(y)))
    print("KERNEL_OK")
</pallas_src>

<mosaic_0001>
module attributes {stable_mosaic.version = 11 : i64} {
  func.func @_l2_normalize_kernel(%arg0: i32, %arg1: memref<1x16x16x3xf32, #tpu.memory_space<vmem>>, %arg2: memref<1x16x16x3xf32, #tpu.memory_space<vmem>>) attributes {dimension_semantics = [#tpu.dimension_semantics<parallel>], iteration_bounds = array<i64: 2>, scalar_prefetch = 0 : i64, scratch_operands = 0 : i64, tpu.core_type = #tpu.core_type<tc>, window_params = [{transform_indices = @transform_0, window_bounds = array<i64: 1, 16, 16, 3>}, {transform_indices = @transform_1, window_bounds = array<i64: 1, 16, 16, 3>}]} {
    %c0 = arith.constant 0 : index
    %c0_0 = arith.constant 0 : index
    %c0_1 = arith.constant 0 : index
    %c0_2 = arith.constant 0 : index
    %0 = vector.load %arg1[%c0, %c0_0, %c0_1, %c0_2] : memref<1x16x16x3xf32, #tpu.memory_space<vmem>>, vector<1x16x16x3xf32>
    %1 = arith.mulf %0, %0 : vector<1x16x16x3xf32>
    %cst = arith.constant dense<0.000000e+00> : vector<1x16x16xf32>
    %2 = vector.multi_reduction <add>, %1, %cst [3] : vector<1x16x16x3xf32> to vector<1x16x16xf32>
    %3 = vector.shape_cast %2 : vector<1x16x16xf32> to vector<1x16x16x1xf32>
    %4 = math.sqrt %3 : vector<1x16x16x1xf32>
    %cst_3 = arith.constant 9.99999996E-13 : f32
    %5 = vector.broadcast %cst_3 : f32 to vector<1x16x16x1xf32>
    %6 = arith.maximumf %4, %5 : vector<1x16x16x1xf32>
    %7 = vector.broadcast %6 : vector<1x16x16x1xf32> to vector<1x16x16x3xf32>
    %8 = arith.divf %0, %7 : vector<1x16x16x3xf32>
    %c0_4 = arith.constant 0 : index
    %c0_5 = arith.constant 0 : index
    %c0_6 = arith.constant 0 : index
    %c0_7 = arith.constant 0 : index
    %9 = vector.load %arg2[%c0_4, %c0_5, %c0_6, %c0_7] : memref<1x16x16x3xf32, #tpu.memory_space<vmem>>, vector<1x16x16x3xf32>
    tpu.vector_store %arg2[%c0_4, %c0_5, %c0_6, %c0_7], %8 {strides = array<i32>} : memref<1x16x16x3xf32, #tpu.memory_space<vmem>>, vector<1x16x16x3xf32>,
    return
  }
  func.func @transform_0(%arg0: i32) -> (i32, i32, i32, i32) {
    %c0_i32 = arith.constant 0 : i32
    %c0_i32_0 = arith.constant 0 : i32
    %c0_i32_1 = arith.constant 0 : i32
    %c0_i32_2 = arith.constant 0 : i32
    return %arg0, %c0_i32, %c0_i32_0, %c0_i32_1 : i32, i32, i32, i32
  }
  func.func @transform_1(%arg0: i32) -> (i32, i32, i32, i32) {
    %c0_i32 = arith.constant 0 : i32
    %c0_i32_0 = arith.constant 0 : i32
    %c0_i32_1 = arith.constant 0 : i32
    %c0_i32_2 = arith.constant 0 : i32
    return %arg0, %c0_i32, %c0_i32_0, %c0_i32_1 : i32, i32, i32, i32
  }
}

</mosaic_0001>

<bundles_post_ra>
// kernel: tpu_custom_call.1
= control target key start
LH: loop header
LB: loop body
LE: loop exit
PB: predicated region body
PF: predicated region fallthrough
CT: control target
= control target key end

     0   :  { %s852_s6 = smov 0   ;;  %s1452_s0 = inlined_call_operand.vmem [shape: f32[2,16,16,3], index: 0, kind: input, shape index: {}]   ;;  %s1453_s1 = inlined_call_operand.vmem [shape: f32[2,16,16,3], index: 1, kind: output, shape index: {}]  }
   0x1 LB: > { %s685_s7 = sadd.s32 4294967295, %s840_s6   ;;  %p689_p0 = scmp.ge.s32.totalorder %s840_s6, 1  ;;  %s840_s6 = sphi %s852_s6, %s11_s6  }
   0x2   : > { %p87_p1 = scmp.lt.s32.totalorder %s840_s6, 3 }
   0x4   : > { %p88_p2 = pnand %p689_p0, %p87_p1 }
   0x5   : > { %p107_p3 = scmp.lt.s32.totalorder (!%p88_p2), %s685_s7, 1 }
   0x6   : > { %91 = sbr.rel (%p88_p2) target bundleno = 267 (0x10b), region = 24 }
   0xb   : > { %s1455_s7 = smov (!%p107_p3, %s685_s7), 1  ;;  %vm181_vm0 = vcmask 23552  }
   0xc   : > { %s696_s8 = sshll.u32 %s1455_s7, 8 }
   0xd   : > { %s868_s11 = scalar_lea.vmem %s1452_s0, %s696_s8  ;;  %s1154_s14 = scalar_lea.vmem %s1453_s1, %s696_s8 }
   0xe   : > { %v871_v0 = vld [vmem:[%s868_s11 + $0x10] sm:$0xff]  ;;  %v874_v1 = vld [vmem:[%s868_s11] sm:$0xff]  ;;  %v877_v2 = vld [vmem:[%s868_s11 + $0x18] sm:$0xff] }
   0xf   : > { %v151_v3 = vmul.f32 %v871_v0, %v871_v0  ;;  %v149_v4 = vmul.f32 %v874_v1, %v874_v1  ;;  %v152_v5 = vmul.f32 %v877_v2, %v877_v2  ;;  %v886_v6 = vld [vmem:[%s868_s11 + $0x8] sm:$0xff]  ;;  %v894_v9 = vld [vmem:[%s868_s11 + $0x20] sm:$0xff]  ;;  %v905_v16 = vld [vmem:[%s868_s11 + $0x38] sm:$0xff] }
  0x10   : > { %v150_v7 = vmul.f32 %v886_v6, %v886_v6  ;;  %v891_v8 = vld [vmem:[%s868_s11 + $0x28] sm:$0xff]  ;;  %v153_v15 = vmul.f32 %v894_v9, %v894_v9  ;;  %v908_v17 = vld [vmem:[%s868_s11 + $0x30] sm:$0xff]  ;;  %v156_v20 = vmul.f32 %v905_v16, %v905_v16  ;;  %v920_v23 = vld [vmem:[%s868_s11 + $0x40] sm:$0xff] }
  0x11   : > { %v188_v10 = vsel %vm181_vm0, %v151_v3, 0.0  ;;  %v182_v11 = vsel %vm181_vm0, %v149_v4, 0.0  ;;  %v191_v12 = vsel %vm181_vm0, %v152_v5, 0.0  ;;  %v154_v14 = vmul.f32 %v891_v8, %v891_v8  ;;  %v917_v22 = vld [vmem:[%s868_s11 + $0x48] sm:$0xff]  ;;  %v929_v28 = vld [vmem:[%s868_s11 + $0x58] sm:$0xff]  ;;  %v932_v29 = vld [vmem:[%s868_s11 + $0x50] sm:$0xff] }
  0x12   : > { %189 = vadd.xlane.f32.xlu1 %v188_v10  ;;  %183 = vadd.xlane.f32.xlu0 %v182_v11  ;;  %v185_v13 = vsel %vm181_vm0, %v150_v7, 0.0  ;;  %v194_v19 = vsel %vm181_vm0, %v153_v15, 0.0  ;;  %v155_v21 = vmul.f32 %v908_v17, %v908_v17  ;;  %v203_v24 = vsel %vm181_vm0, %v156_v20, 0.0  ;;  %v941_v34 = vld [vmem:[%s868_s11 + $0x68] sm:$0xff]  ;;  %v944_v35 = vld [vmem:[%s868_s11 + $0x60] sm:$0xff]  ;;  %v953_v40 = vld [vmem:[%s868_s11 + $0x78] sm:$0xff] }
  0x13   : > { %v197_v18 = vsel %vm181_vm0, %v154_v14, 0.0  ;;  %v158_v26 = vmul.f32 %v917_v22, %v917_v22  ;;  %v157_v27 = vmul.f32 %v920_v23, %v920_v23  ;;  %v160_v32 = vmul.f32 %v929_v28, %v929_v28  ;;  %v956_v41 = vld [vmem:[%s868_s11 + $0x70] sm:$0xff]  ;;  %v965_v46 = vld [vmem:[%s868_s11 + $0x88] sm:$0xff]  ;;  %v968_v47 = vld [vmem:[%s868_s11 + $0x80] sm:$0xff] }
  0x14   : > { %v200_v25 = vsel %vm181_vm0, %v155_v21, 0.0  ;;  %v159_v33 = vmul.f32 %v932_v29, %v932_v29  ;;  %v162_v38 = vmul.f32 %v941_v34, %v941_v34  ;;  %v161_v39 = vmul.f32 %v944_v35, %v944_v35  ;;  %v977_v52 = vld [vmem:[%s868_s11 + $0x98] sm:$0xff]  ;;  %v980_v53 = vld [vmem:[%s868_s11 + $0x90] sm:$0xff]  ;;  %v989_v58 = vld [vmem:[%s868_s11 + $0xa8] sm:$0xff] }
  0x15   : > { %v209_v30 = vsel %vm181_vm0, %v158_v26, 0.0  ;;  %v206_v31 = vsel %vm181_vm0, %v157_v27, 0.0  ;;  %v215_v36 = vsel %vm181_vm0, %v160_v32, 0.0  ;;  %v164_v44 = vmul.f32 %v953_v40, %v953_v40  ;;  %v992_v59 = vld [vmem:[%s868_s11 + $0xa0] sm:$0xff]  ;;  %v1001_v3 = vld [vmem:[%s868_s11 + $0xb8] sm:$0xff]  ;;  %v1004_v4 = vld [vmem:[%s868_s11 + $0xb0] sm:$0xff] }
  0x16   : > { %192 = vadd.xlane.f32.xlu1 %v191_v12  ;;  %186 = vadd.xlane.f32.xlu0 %v185_v13  ;;  %v212_v37 = vsel %vm181_vm0, %v159_v33, 0.0  ;;  %v221_v42 = vsel %vm181_vm0, %v162_v38, 0.0  ;;  %v218_v43 = vsel %vm181_vm0, %v161_v39, 0.0  ;;  %v163_v45 = vmul.f32 %v956_v41, %v956_v41  ;;  %v1013_v12 = vld [vmem:[%s868_s11 + $0xc8] sm:$0xff]  ;;  %v1016_v13 = vld [vmem:[%s868_s11 + $0xc0] sm:$0xff]  ;;  %v1025_v20 = vld [vmem:[%s868_s11 + $0xd8] sm:$0xff] }
  0x17   : > { %v227_v48 = vsel %vm181_vm0, %v164_v44, 0.0  ;;  %v166_v50 = vmul.f32 %v965_v46, %v965_v46  ;;  %v165_v51 = vmul.f32 %v968_v47, %v968_v47  ;;  %v168_v56 = vmul.f32 %v977_v52, %v977_v52  ;;  %v1028_v21 = vld [vmem:[%s868_s11 + $0xd0] sm:$0xff]  ;;  %v1049_v38 = vld [vmem:[%s868_s11 + $0xf8] sm:$0xff] }
  0x18   : > { %v224_v49 = vsel %vm181_vm0, %v163_v45, 0.0  ;;  %v167_v57 = vmul.f32 %v980_v53, %v980_v53  ;;  %v170_v62 = vmul.f32 %v989_v58, %v989_v58  ;;  %v169_v63 = vmul.f32 %v992_v59, %v992_v59  ;;  %v1052_v39 = vld [vmem:[%s868_s11 + $0xf0] sm:$0xff] }
  0x19   : > { %v233_v54 = vsel %vm181_vm0, %v166_v50, 0.0  ;;  %v230_v55 = vsel %vm181_vm0, %v165_v51, 0.0  ;;  %v239_v60 = vsel %vm181_vm0, %v168_v56, 0.0  ;;  %v172_v10 = vmul.f32 %v1001_v3, %v1001_v3 }
  0x1a   : > { %198 = vadd.xlane.f32.xlu1 %v197_v18  ;;  %195 = vadd.xlane.f32.xlu0 %v194_v19  ;;  %v236_v61 = vsel %vm181_vm0, %v167_v57, 0.0  ;;  %v245_v5 = vsel %vm181_vm0, %v170_v62, 0.0  ;;  %v242_v7 = vsel %vm181_vm0, %v169_v63, 0.0  ;;  %v171_v11 = vmul.f32 %v1004_v4, %v1004_v4 }
  0x1b   : > { %v251_v14 = vsel %vm181_vm0, %v172_v10, 0.0  ;;  %v174_v18 = vmul.f32 %v1013_v12, %v1013_v12  ;;  %v173_v19 = vmul.f32 %v1016_v13, %v1016_v13  ;;  %v176_v26 = vmul.f32 %v1025_v20, %v1025_v20 }
  0x1c   : > { %v248_v15 = vsel %vm181_vm0, %v171_v11, 0.0  ;;  %v175_v27 = vmul.f32 %v1028_v21, %v1028_v21  ;;  %v180_v44 = vmul.f32 %v1049_v38, %v1049_v38  ;;  %v179_v45 = vmul.f32 %v1052_v39, %v1052_v39 }
  0x1d   : > { %v263_v32 = vsel %vm181_vm0, %v176_v26, 0.0 }
  0x1e   : > { %204 = vadd.xlane.f32.xlu1 %v203_v24  ;;  %201 = vadd.xlane.f32.xlu0 %v200_v25  ;;  %v257_v24 = vsel %vm181_vm0, %v174_v18, 0.0  ;;  %v254_v25 = vsel %vm181_vm0, %v173_v19, 0.0  ;;  %v260_v33 = vsel %vm181_vm0, %v175_v27, 0.0 }
  0x22   : > { %210 = vadd.xlane.f32.xlu1 %v209_v30  ;;  %207 = vadd.xlane.f32.xlu0 %v206_v31  ;;  %v1037_v30 = vld [vmem:[%s868_s11 + $0xe8] sm:$0xff]  ;;  %v1040_v31 = vld [vmem:[%s868_s11 + $0xe0] sm:$0xff] }
  0x26   : > { %216 = vadd.xlane.f32.xlu1 %v215_v36  ;;  %213 = vadd.xlane.f32.xlu0 %v212_v37  ;;  %v178_v36 = vmul.f32 %v1037_v30, %v1037_v30  ;;  %v177_v37 = vmul.f32 %v1040_v31, %v1040_v31 }
  0x2a   : > { %222 = vadd.xlane.f32.xlu1 %v221_v42  ;;  %219 = vadd.xlane.f32.xlu0 %v218_v43  ;;  %v269_v42 = vsel %vm181_vm0, %v178_v36, 0.0  ;;  %v266_v43 = vsel %vm181_vm0, %v177_v37, 0.0 }
  0x2e   : > { %228 = vadd.xlane.f32.xlu1 %v227_v48  ;;  %225 = vadd.xlane.f32.xlu0 %v224_v49  ;;  %v275_v48 = vsel %vm181_vm0, %v180_v44, 0.0  ;;  %v272_v49 = vsel %vm181_vm0, %v179_v45, 0.0 }
  0x32   : > { %234 = vadd.xlane.f32.xlu1 %v233_v54  ;;  %231 = vadd.xlane.f32.xlu0 %v230_v55 }
  0x36   : > { %240 = vadd.xlane.f32.xlu1 %v239_v60  ;;  %237 = vadd.xlane.f32.xlu0 %v236_v61 }
  0x3a   : > { %246 = vadd.xlane.f32.xlu1 %v245_v5  ;;  %243 = vadd.xlane.f32.xlu0 %v242_v7 }
  0x3e   : > { %252 = vadd.xlane.f32.xlu1 %v251_v14  ;;  %249 = vadd.xlane.f32.xlu0 %v248_v15 }
  0x42   : > { %258 = vadd.xlane.f32.xlu1 %v257_v24  ;;  %255 = vadd.xlane.f32.xlu0 %v254_v25 }
  0x46   : > { %264 = vadd.xlane.f32.xlu1 %v263_v32  ;;  %261 = vadd.xlane.f32.xlu0 %v260_v33 }
  0x4a   : > { %270 = vadd.xlane.f32.xlu1 %v269_v42  ;;  %267 = vadd.xlane.f32.xlu0 %v266_v43 }
  0x4e   : > { %276 = vadd.xlane.f32.xlu1 %v275_v48  ;;  %273 = vadd.xlane.f32.xlu0 %v272_v49 }
  0x9b   : > { %v190_v50 = vpop.xlane.xlu1 %189  ;;  %v184_v51 = vpop.xlane.xlu0 %183 }
  0x9c   : > { %706 = vrsqrt.f32 %v190_v50  ;;  %vm294_vm1 = vcmp.eq.f32.partialorder %v190_v50, inf  ;;  %vm296_vm2 = vcmp.eq.f32.partialorder %v190_v50, 0.0  ;;  %v297_v7 = vand.u32 2147483648, %v190_v50 }
  0x9d   : > { %708 = vrsqrt.f32 %v184_v51  ;;  %vm280_vm3 = vcmp.eq.f32.partialorder %v184_v51, inf  ;;  %vm282_vm4 = vcmp.eq.f32.partialorder %v184_v51, 0.0  ;;  %v283_v11 = vand.u32 2147483648, %v184_v51 }
  0x9f   : > { %v193_v54 = vpop.xlane.xlu1 %192  ;;  %v187_v55 = vpop.xlane.xlu0 %186 }
  0xa0   : > { %710 = vrsqrt.f32 %v193_v54  ;;  %vm301_vm5 = vcmp.eq.f32.partialorder %v193_v54, inf  ;;  %vm303_vm6 = vcmp.eq.f32.partialorder %v193_v54, 0.0  ;;  %v304_v19 = vand.u32 2147483648, %v193_v54 }
  0xa1   : > { %712 = vrsqrt.f32 %v187_v55  ;;  %vm287_vm7 = vcmp.eq.f32.partialorder %v187_v55, inf  ;;  %vm289_vm8 = vcmp.eq.f32.partialorder %v187_v55, 0.0  ;;  %v290_v37 = vand.u32 2147483648, %v187_v55 }
  0xa3   : > { %v1062_v56 = vpop.xlane.xlu1 %198  ;;  %v1064_v57 = vpop.xlane.xlu0 %195 }
  0xa4   : > { %714 = vrsqrt.f32 %v1062_v56  ;;  %vm315_vm9 = vcmp.eq.f32.partialorder %v1062_v56, inf  ;;  %vm317_vm10 = vcmp.eq.f32.partialorder %v1062_v56, 0.0  ;;  %v318_v49 = vand.u32 2147483648, %v1062_v56 }
  0xa5   : > { %716 = vrsqrt.f32 %v1064_v57  ;;  %vm308_vm11 = vcmp.eq.f32.partialorder %v1064_v57, inf  ;;  %vm310_vm12 = vcmp.eq.f32.partialorder %v1064_v57, 0.0 }
  0xa7   : > { %v1068_v60 = vpop.xlane.xlu1 %204  ;;  %v1070_v61 = vpop.xlane.xlu0 %201 }
  0xa8   : > { %718 = vrsqrt.f32 %v1068_v60  ;;  %vm329_vm13 = vcmp.eq.f32.partialorder %v1068_v60, inf  ;;  %vm331_vm14 = vcmp.eq.f32.partialorder %v1068_v60, 0.0  ;;  %vm322_vm15 = vcmp.eq.f32.partialorder %v1070_v61, inf }
  0xa9   : > { %v707_v62 = vpop.eup %706  ;;  %720 = vrsqrt.f32 %v1070_v61 }
  0xaa   : > { %v709_v63 = vpop.eup %708  ;;  %v293_v5 = vmul.f32 %v707_v62, %v190_v50 }
  0xab   : > { %v279_v10 = vmul.f32 %v709_v63, %v184_v51  ;;  %v1074_v14 = vpop.xlane.xlu1 %210  ;;  %v1076_v15 = vpop.xlane.xlu0 %207 }
  0xac   : > { %v295_v18 = vsel %vm294_vm1, %v190_v50, %v293_v5  ;;  %722 = vrsqrt.f32 %v1074_v14  ;;  %vm324_vm1 = vcmp.eq.f32.partialorder %v1070_v61, 0.0 }
  0xad   : > { %v711_v24 = vpop.eup %710  ;;  %v298_v25 = vsel %vm296_vm2, %v297_v7, %v295_v18  ;;  %v281_v26 = vsel %vm280_vm3, %v184_v51, %v279_v10  ;;  %724 = vrsqrt.f32 %v1076_v15  ;;  %vm343_vm2 = vcmp.eq.f32.partialorder %v1074_v14, inf }
  0xae   : > { %v713_v27 = vpop.eup %712  ;;  %v504_v32 = vmax.f32 %v298_v25, 1e-12  ;;  %v284_v33 = vsel %vm282_vm4, %v283_v11, %v281_v26  ;;  %v300_v36 = vmul.f32 %v711_v24, %v193_v54  ;;  %v311_v24 = vand.u32 2147483648, %v1064_v57 }
  0xaf   : > { %v502_v42 = vmax.f32 %v284_v33, 1e-12  ;;  %v286_v43 = vmul.f32 %v713_v27, %v187_v55  ;;  %v1084_v44 = vpop.xlane.xlu1 %216  ;;  %v1086_v45 = vpop.xlane.xlu0 %213  ;;  %vm345_vm3 = vcmp.eq.f32.partialorder %v1074_v14, 0.0  ;;  %vm336_vm4 = vcmp.eq.f32.partialorder %v1076_v15, inf }
  0xb0   : > { %726 = vrcp.f32 %v504_v32  ;;  %v302_v48 = vsel %vm301_vm5, %v193_v54, %v300_v36  ;;  %v332_v32 = vand.u32 2147483648, %v1068_v60  ;;  %vm338_vm5 = vcmp.eq.f32.partialorder %v1076_v15, 0.0 }
  0xb1   : > { %v715_v50 = vpop.eup %714  ;;  %728 = vrcp.f32 %v502_v42  ;;  %v305_v51 = vsel %vm303_vm6, %v304_v19, %v302_v48  ;;  %v288_v62 = vsel %vm287_vm7, %v187_v55, %v286_v43  ;;  %vm357_vm6 = vcmp.eq.f32.partialorder %v1084_v44, inf }
  0xb2   : > { %v717_v63 = vpop.eup %716  ;;  %v505_v5 = vmax.f32 %v305_v51, 1e-12  ;;  %v291_v7 = vsel %vm289_vm8, %v290_v37, %v288_v62  ;;  %v314_v10 = vmul.f32 %v715_v50, %v1062_v56  ;;  %730 = vrsqrt.f32 %v1084_v44 }
  0xb3   : > { %v503_v11 = vmax.f32 %v291_v7, 1e-12  ;;  %v307_v18 = vmul.f32 %v717_v63, %v1064_v57  ;;  %732 = vrsqrt.f32 %v1086_v45  ;;  %v1100_v54 = vpop.xlane.xlu1 %222  ;;  %v1102_v19 = vpop.xlane.xlu0 %219  ;;  %v325_v50 = vand.u32 2147483648, %v1070_v61 }
  0xb4   : > { %734 = vrcp.f32 %v505_v5  ;;  %v316_v55 = vsel %vm315_vm9, %v1062_v56, %v314_v10  ;;  %vm359_vm7 = vcmp.eq.f32.partialorder %v1084_v44, 0.0  ;;  %vm350_vm8 = vcmp.eq.f32.partialorder %v1086_v45, inf }
  0xb5   : > { %v719_v25 = vpop.eup %718  ;;  %736 = vrcp.f32 %v503_v11  ;;  %v319_v26 = vsel %vm317_vm10, %v318_v49, %v316_v55  ;;  %v309_v27 = vsel %vm308_vm11, %v1064_v57, %v307_v18  ;;  %vm352_vm9 = vcmp.eq.f32.partialorder %v1086_v45, 0.0 }
  0xb6   : > { %v721_v33 = vpop.eup %720  ;;  %v507_v36 = vmax.f32 %v319_v26, 1e-12  ;;  %v312_v37 = vsel %vm310_vm12, %v311_v24, %v309_v27  ;;  %v328_v42 = vmul.f32 %v719_v25, %v1068_v60  ;;  %738 = vrsqrt.f32 %v1100_v54 }
  0xb7   : > { %v506_v43 = vmax.f32 %v312_v37, 1e-12  ;;  %v321_v48 = vmul.f32 %v721_v33, %v1070_v61  ;;  %v1122_v56 = vpop.xlane.xlu1 %228  ;;  %v1124_v49 = vpop.xlane.xlu0 %225  ;;  %v346_v24 = vand.u32 2147483648, %v1074_v14  ;;  %v339_v26 = vand.u32 2147483648, %v1076_v15 }
  0xb8   : > { %740 = vrcp.f32 %v507_v36  ;;  %v330_v57 = vsel %vm329_vm13, %v1068_v60, %v328_v42  ;;  %vm371_vm10 = vcmp.eq.f32.partialorder %v1100_v54, inf  ;;  %vm373_vm11 = vcmp.eq.f32.partialorder %v1100_v54, 0.0 }
  0xb9   : > { %v723_v51 = vpop.eup %722  ;;  %742 = vrcp.f32 %v506_v43  ;;  %v333_v62 = vsel %vm331_vm14, %v332_v32, %v330_v57  ;;  %v323_v63 = vsel %vm322_vm15, %v1070_v61, %v321_v48  ;;  %vm364_vm12 = vcmp.eq.f32.partialorder %v1102_v19, inf }
  0xba   : > { %v725_v5 = vpop.eup %724  ;;  %v509_v7 = vmax.f32 %v333_v62, 1e-12  ;;  %v326_v10 = vsel %vm324_vm1, %v325_v50, %v323_v63  ;;  %v342_v11 = vmul.f32 %v723_v51, %v1074_v14  ;;  %744 = vrsqrt.f32 %v1102_v19 }
  0xbb   : > { %v508_v18 = vmax.f32 %v326_v10, 1e-12  ;;  %v335_v55 = vmul.f32 %v725_v5, %v1076_v15  ;;  %746 = vrsqrt.f32 %v1122_v56  ;;  %v1140_v60 = vpop.xlane.xlu1 %234  ;;  %v1142_v61 = vpop.xlane.xlu0 %231  ;;  %v360_v62 = vand.u32 2147483648, %v1084_v44 }
  0xbc   : > { %748 = vrcp.f32 %v509_v7  ;;  %v344_v25 = vsel %vm343_vm2, %v1074_v14, %v342_v11  ;;  %v353_v5 = vand.u32 2147483648, %v1086_v45  ;;  %vm366_vm13 = vcmp.eq.f32.partialorder %v1102_v19, 0.0 }
  0xbd   : > { %v727_v27 = vpop.eup %726  ;;  %750 = vrcp.f32 %v508_v18  ;;  %v347_v32 = vsel %vm345_vm3, %v346_v24, %v344_v25  ;;  %v337_v33 = vsel %vm336_vm4, %v1076_v15, %v335_v55  ;;  %vm385_vm14 = vcmp.eq.f32.partialorder %v1122_v56, inf }
  0xbe   : > { %v729_v36 = vpop.eup %728  ;;  %v539_v37 = vmul.f32 %v727_v27, %v871_v0  ;;  %v511_v42 = vmax.f32 %v347_v32, 1e-12  ;;  %v340_v43 = vsel %vm338_vm5, %v339_v26, %v337_v33  ;;  %752 = vrsqrt.f32 %v1124_v49 }
  0xbf   : > { %v731_v48 = vpop.eup %730  ;;  %v535_v57 = vmul.f32 %v729_v36, %v874_v1  ;;  %v510_v50 = vmax.f32 %v340_v43, 1e-12  ;;  %v1165_v14 = vpop.xlane.xlu1 %240  ;;  %vm387_vm15 = vcmp.eq.f32.partialorder %v1122_v56, 0.0  ;;  %vm378_vm1 = vcmp.eq.f32.partialorder %v1124_v49, inf }
  0xc0   : > { %v1167_v51 = vpop.xlane.xlu0 %237  ;;  %v733_v15 = vpop.eup %732  ;;  %600 = vst.msk [vmem:[%s1154_s14 + $0x10] sm:$0xff] %vm181_vm0, %v539_v37  ;;  %754 = vrcp.f32 %v511_v42  ;;  %v356_v0 = vmul.f32 %v731_v48, %v1084_v44  ;;  %vm380_vm2 = vcmp.eq.f32.partialorder %v1124_v49, 0.0  ;;  %vm399_vm3 = vcmp.eq.f32.partialorder %v1140_v60, inf }
  0xc1   : > { %v735_v1 = vpop.eup %734  ;;  %598 = vst.msk [vmem:[%s1154_s14] sm:$0xff] %vm181_vm0, %v535_v57  ;;  %756 = vrcp.f32 %v510_v50  ;;  %v349_v63 = vmul.f32 %v733_v15, %v1086_v45  ;;  %v367_v50 = vand.u32 2147483648, %v1102_v19  ;;  %vm401_vm4 = vcmp.eq.f32.partialorder %v1140_v60, 0.0 }
  0xc2   : > { %v737_v7 = vpop.eup %736  ;;  %v541_v10 = vmul.f32 %v735_v1, %v877_v2  ;;  %v358_v11 = vsel %vm357_vm6, %v1084_v44, %v356_v0  ;;  %758 = vrsqrt.f32 %v1140_v60  ;;  %v374_v44 = vand.u32 2147483648, %v1100_v54 }
  0xc3   : > { %v739_v18 = vpop.eup %738  ;;  %v537_v24 = vmul.f32 %v737_v7, %v886_v6  ;;  %v361_v55 = vsel %vm359_vm7, %v360_v62, %v358_v11  ;;  %v351_v25 = vsel %vm350_vm8, %v1086_v45, %v349_v63  ;;  %760 = vrsqrt.f32 %v1142_v61  ;;  %v1190_v2 = vpop.xlane.xlu1 %246 }
  0xc4   : > { %601 = vst.msk [vmem:[%s1154_s14 + $0x18] sm:$0xff] %vm181_vm0, %v541_v10  ;;  %v513_v26 = vmax.f32 %v361_v55, 1e-12  ;;  %v354_v27 = vsel %vm352_vm9, %v353_v5, %v351_v25  ;;  %v370_v32 = vmul.f32 %v739_v18, %v1100_v54  ;;  %762 = vrsqrt.f32 %v1165_v14  ;;  %v1201_v45 = vpop.xlane.xlu0 %243 }
  0xc5   : > { %v741_v33 = vpop.eup %740  ;;  %599 = vst.msk [vmem:[%s1154_s14 + $0x8] sm:$0xff] %vm181_vm0, %v537_v24  ;;  %v512_v6 = vmax.f32 %v354_v27, 1e-12  ;;  %v381_v27 = vand.u32 2147483648, %v1124_v49  ;;  %vm392_vm5 = vcmp.eq.f32.partialorder %v1142_v61, inf  ;;  %vm394_vm6 = vcmp.eq.f32.partialorder %v1142_v61, 0.0 }
  0xc6   : > { %v743_v36 = vpop.eup %742  ;;  %v545_v37 = vmul.f32 %v741_v33, %v891_v8  ;;  %764 = vrcp.f32 %v513_v26  ;;  %v372_v42 = vsel %vm371_vm10, %v1100_v54, %v370_v32  ;;  %v388_v54 = vand.u32 2147483648, %v1122_v56 }
  0xc7   : > { %v745_v43 = vpop.eup %744  ;;  %v543_v48 = vmul.f32 %v743_v36, %v894_v9  ;;  %766 = vrcp.f32 %v512_v6  ;;  %v375_v57 = vsel %vm373_vm11, %v374_v44, %v372_v42  ;;  %v1217_v62 = vpop.xlane.xlu1 %252  ;;  %v402_v6 = vand.u32 2147483648, %v1140_v60 }
  0xc8   : > { %v747_v15 = vpop.eup %746  ;;  %603 = vst.msk [vmem:[%s1154_s14 + $0x28] sm:$0xff] %vm181_vm0, %v545_v37  ;;  %v515_v8 = vmax.f32 %v375_v57, 1e-12  ;;  %v363_v0 = vmul.f32 %v745_v43, %v1102_v19  ;;  %768 = vrsqrt.f32 %v1167_v51  ;;  %v395_v57 = vand.u32 2147483648, %v1142_v61 }
  0xc9   : > { %v749_v1 = vpop.eup %748  ;;  %602 = vst.msk [vmem:[%s1154_s14 + $0x20] sm:$0xff] %vm181_vm0, %v543_v48  ;;  %v384_v9 = vmul.f32 %v747_v15, %v1122_v56  ;;  %770 = vrsqrt.f32 %v1190_v2  ;;  %vm413_vm7 = vcmp.eq.f32.partialorder %v1165_v14, inf  ;;  %vm415_vm8 = vcmp.eq.f32.partialorder %v1165_v14, 0.0 }
  0xca   : > { %v751_v63 = vpop.eup %750  ;;  %v549_v5 = vmul.f32 %v749_v1, %v905_v16  ;;  %772 = vrcp.f32 %v515_v8  ;;  %v365_v7 = vsel %vm364_vm12, %v1102_v19, %v363_v0  ;;  %v1237_v16 = vpop.xlane.xlu0 %249  ;;  %v416_v8 = vand.u32 2147483648, %v1165_v14 }
  0xcb   : > { %v753_v10 = vpop.eup %752  ;;  %v547_v11 = vmul.f32 %v751_v63, %v908_v17  ;;  %v368_v18 = vsel %vm366_vm13, %v367_v50, %v365_v7  ;;  %v386_v24 = vsel %vm385_vm14, %v1122_v56, %v384_v9  ;;  %774 = vrsqrt.f32 %v1201_v45  ;;  %v1255_v44 = vpop.xlane.xlu1 %258 }
  0xcc   : > { %605 = vst.msk [vmem:[%s1154_s14 + $0x38] sm:$0xff] %vm181_vm0, %v549_v5  ;;  %v514_v55 = vmax.f32 %v368_v18, 1e-12  ;;  %v389_v25 = vsel %vm387_vm15, %v388_v54, %v386_v24  ;;  %v377_v26 = vmul.f32 %v753_v10, %v1124_v49  ;;  %vm406_vm9 = vcmp.eq.f32.partialorder %v1167_v51, inf }
  0xcd   : > { %v755_v17 = vpop.eup %754  ;;  %604 = vst.msk [vmem:[%s1154_s14 + $0x30] sm:$0xff] %vm181_vm0, %v547_v11  ;;  %v517_v19 = vmax.f32 %v389_v25, 1e-12  ;;  %vm408_vm10 = vcmp.eq.f32.partialorder %v1167_v51, 0.0  ;;  %vm427_vm11 = vcmp.eq.f32.partialorder %v1190_v2, inf  ;;  %vm429_vm12 = vcmp.eq.f32.partialorder %v1190_v2, 0.0 }
  0xce   : > { %v757_v32 = vpop.eup %756  ;;  %v553_v33 = vmul.f32 %v755_v17, %v917_v22  ;;  %776 = vrcp.f32 %v514_v55  ;;  %v379_v56 = vsel %vm378_vm1, %v1124_v49, %v377_v26  ;;  %v1272_v49 = vpop.xlane.xlu0 %255  ;;  %v409_v26 = vand.u32 2147483648, %v1167_v51 }
  0xcf   : > { %v759_v36 = vpop.eup %758  ;;  %v551_v37 = vmul.f32 %v757_v32, %v920_v23  ;;  %778 = vrcp.f32 %v517_v19  ;;  %v382_v42 = vsel %vm380_vm2, %v381_v27, %v379_v56  ;;  %vm420_vm13 = vcmp.eq.f32.partialorder %v1201_v45, inf }
  0xd0   : > { %v761_v22 = vpop.eup %760  ;;  %607 = vst.msk [vmem:[%s1154_s14 + $0x48] sm:$0xff] %vm181_vm0, %v553_v33  ;;  %v516_v43 = vmax.f32 %v382_v42, 1e-12  ;;  %v398_v48 = vmul.f32 %v759_v36, %v1140_v60  ;;  %780 = vrsqrt.f32 %v1217_v62  ;;  %v430_v33 = vand.u32 2147483648, %v1190_v2 }
  0xd1   : > { %606 = vst.msk [vmem:[%s1154_s14 + $0x40] sm:$0xff] %vm181_vm0, %v551_v37  ;;  %v391_v23 = vmul.f32 %v761_v22, %v1142_v61  ;;  %782 = vrsqrt.f32 %v1237_v16  ;;  %v763_v50 = vpop.eup %762  ;;  %vm422_vm14 = vcmp.eq.f32.partialorder %v1201_v45, 0.0  ;;  %vm441_vm15 = vcmp.eq.f32.partialorder %v1217_v62, inf }
  0xd2   : > { %784 = vrcp.f32 %v516_v43  ;;  %v400_v15 = vsel %vm399_vm3, %v1140_v60, %v398_v48  ;;  %v412_v54 = vmul.f32 %v763_v50, %v1165_v14  ;;  %v1290_v60 = vpop.xlane.xlu1 %264  ;;  %v1307_v27 = vpop.xlane.xlu0 %261  ;;  %vm443_vm1 = vcmp.eq.f32.partialorder %v1217_v62, 0.0 }
  0xd3   : > { %v765_v0 = vpop.eup %764  ;;  %v403_v1 = vsel %vm401_vm4, %v402_v6, %v400_v15  ;;  %v393_v9 = vsel %vm392_vm5, %v1142_v61, %v391_v23  ;;  %786 = vrsqrt.f32 %v1255_v44  ;;  %vm434_vm2 = vcmp.eq.f32.partialorder %v1237_v16, inf }
  0xd4   : > { %v767_v63 = vpop.eup %766  ;;  %v557_v5 = vmul.f32 %v765_v0, %v929_v28  ;;  %v519_v7 = vmax.f32 %v403_v1, 1e-12  ;;  %v396_v10 = vsel %vm394_vm6, %v395_v57, %v393_v9  ;;  %v414_v55 = vsel %vm413_vm7, %v1165_v14, %v412_v54 }
  0xd5   : > { %v769_v11 = vpop.eup %768  ;;  %v555_v18 = vmul.f32 %v767_v63, %v932_v29  ;;  %v518_v24 = vmax.f32 %v396_v10, 1e-12  ;;  %v417_v61 = vsel %vm415_vm8, %v416_v8, %v414_v55  ;;  %vm436_vm3 = vcmp.eq.f32.partialorder %v1237_v16, 0.0 }
  0xd6   : > { %v771_v28 = vpop.eup %770  ;;  %609 = vst.msk [vmem:[%s1154_s14 + $0x58] sm:$0xff] %vm181_vm0, %v557_v5  ;;  %788 = vrcp.f32 %v519_v7  ;;  %v405_v25 = vmul.f32 %v769_v11, %v1167_v51  ;;  %v521_v29 = vmax.f32 %v417_v61, 1e-12  ;;  %v1323_v22 = vpop.xlane.xlu1 %270  ;;  %v437_v10 = vand.u32 2147483648, %v1237_v16 }
  0xd7   : > { %v773_v17 = vpop.eup %772  ;;  %608 = vst.msk [vmem:[%s1154_s14 + $0x50] sm:$0xff] %vm181_vm0, %v555_v18  ;;  %790 = vrcp.f32 %v518_v24  ;;  %v426_v19 = vmul.f32 %v771_v28, %v1190_v2  ;;  %v1333_v0 = vpop.xlane.xlu0 %267  ;;  %vm455_vm4 = vcmp.eq.f32.partialorder %v1255_v44, inf  ;;  %v458_v61 = vand.u32 2147483648, %v1255_v44 }
  0xd8   : > { %v561_v32 = vmul.f32 %v773_v17, %v941_v34  ;;  %v407_v14 = vsel %vm406_vm9, %v1167_v51, %v405_v25  ;;  %792 = vrsqrt.f32 %v1272_v49  ;;  %v775_v56 = vpop.eup %774  ;;  %v423_v51 = vand.u32 2147483648, %v1201_v45 }
  0xd9   : > { %794 = vrcp.f32 %v521_v29  ;;  %v410_v6 = vsel %vm408_vm10, %v409_v26, %v407_v14  ;;  %v428_v36 = vsel %vm427_vm11, %v1190_v2, %v426_v19  ;;  %v419_v42 = vmul.f32 %v775_v56, %v1201_v45 }
  0xda   : > { %611 = vst.msk [vmem:[%s1154_s14 + $0x68] sm:$0xff] %vm181_vm0, %v561_v32  ;;  %v520_v34 = vmax.f32 %v410_v6, 1e-12  ;;  %v431_v37 = vsel %vm429_vm12, %v430_v33, %v428_v36  ;;  %796 = vrsqrt.f32 %v1290_v60  ;;  %v1351_v11 = vpop.xlane.xlu1 %276  ;;  %vm457_vm5 = vcmp.eq.f32.partialorder %v1255_v44, 0.0 }
  0xdb   : > { %v777_v43 = vpop.eup %776  ;;  %v523_v48 = vmax.f32 %v431_v37, 1e-12  ;;  %798 = vrsqrt.f32 %v1307_v27  ;;  %v421_v57 = vsel %vm420_vm13, %v1201_v45, %v419_v42  ;;  %vm448_vm6 = vcmp.eq.f32.partialorder %v1272_v49, inf }
  0xdc   : > { %v779_v2 = vpop.eup %778  ;;  %v559_v23 = vmul.f32 %v777_v43, %v944_v35  ;;  %800 = vrcp.f32 %v520_v34  ;;  %v424_v8 = vsel %vm422_vm14, %v423_v51, %v421_v57  ;;  %vm450_vm7 = vcmp.eq.f32.partialorder %v1272_v49, 0.0 }
  0xdd   : > { %v781_v50 = vpop.eup %780  ;;  %v565_v15 = vmul.f32 %v779_v2, %v953_v40  ;;  %802 = vrcp.f32 %v523_v48  ;;  %v522_v9 = vmax.f32 %v424_v8, 1e-12  ;;  %v444_v40 = vand.u32 2147483648, %v1217_v62 }
  0xde   : > { %v783_v1 = vpop.eup %782  ;;  %610 = vst.msk [vmem:[%s1154_s14 + $0x60] sm:$0xff] %vm181_vm0, %v559_v23  ;;  %v440_v35 = vmul.f32 %v781_v50, %v1217_v62  ;;  %804 = vrsqrt.f32 %v1323_v22  ;;  %vm469_vm8 = vcmp.eq.f32.partialorder %v1290_v60, inf  ;;  %vm471_vm9 = vcmp.eq.f32.partialorder %v1290_v60, 0.0 }
  0xdf   : > { %v785_v45 = vpop.eup %784  ;;  %613 = vst.msk [vmem:[%s1154_s14 + $0x78] sm:$0xff] %vm181_vm0, %v565_v15  ;;  %v433_v54 = vmul.f32 %v783_v1, %v1237_v16  ;;  %806 = vrcp.f32 %v522_v9  ;;  %vm462_vm10 = vcmp.eq.f32.partialorder %v1307_v27, inf  ;;  %v465_v57 = vand.u32 2147483648, %v1307_v27 }
  0xe0   : > { %v787_v63 = vpop.eup %786  ;;  %v563_v5 = vmul.f32 %v785_v45, %v956_v41  ;;  %v442_v7 = vsel %vm441_vm15, %v1217_v62, %v440_v35  ;;  %808 = vrsqrt.f32 %v1333_v0  ;;  %vm464_vm11 = vcmp.eq.f32.partialorder %v1307_v27, 0.0 }
  0xe1   : > { %v445_v18 = vsel %vm443_vm1, %v444_v40, %v442_v7  ;;  %v435_v24 = vsel %vm434_vm2, %v1237_v16, %v433_v54  ;;  %v454_v55 = vmul.f32 %v787_v63, %v1255_v44  ;;  %810 = vrsqrt.f32 %v1351_v11  ;;  %v1363_v16 = vpop.xlane.xlu0 %273 }
  0xe2   : > { %612 = vst.msk [vmem:[%s1154_s14 + $0x70] sm:$0xff] %vm181_vm0, %v563_v5  ;;  %v525_v28 = vmax.f32 %v445_v18, 1e-12  ;;  %v438_v41 = vsel %vm436_vm3, %v437_v10, %v435_v24  ;;  %vm483_vm12 = vcmp.eq.f32.partialorder %v1323_v22, inf  ;;  %vm485_vm13 = vcmp.eq.f32.partialorder %v1323_v22, 0.0 }
  0xe3   : > { %v789_v62 = vpop.eup %788  ;;  %v524_v25 = vmax.f32 %v438_v41, 1e-12  ;;  %v456_v26 = vsel %vm455_vm4, %v1255_v44, %v454_v55  ;;  %vm476_vm14 = vcmp.eq.f32.partialorder %v1333_v0, inf  ;;  %v479_v18 = vand.u32 2147483648, %v1333_v0 }
  0xe4   : > { %v791_v17 = vpop.eup %790  ;;  %v569_v29 = vmul.f32 %v789_v62, %v965_v46  ;;  %812 = vrcp.f32 %v525_v28  ;;  %v459_v19 = vsel %vm457_vm5, %v458_v61, %v456_v26  ;;  %vm478_vm15 = vcmp.eq.f32.partialorder %v1333_v0, 0.0 }
  0xe5   : > { %v793_v32 = vpop.eup %792  ;;  %v567_v14 = vmul.f32 %v791_v17, %v968_v47  ;;  %814 = vrcp.f32 %v524_v25  ;;  %v527_v33 = vmax.f32 %v459_v19, 1e-12  ;;  %v451_v47 = vand.u32 2147483648, %v1272_v49 }
  0xe6   : > { %v795_v56 = vpop.eup %794  ;;  %615 = vst.msk [vmem:[%s1154_s14 + $0x88] sm:$0xff] %vm181_vm0, %v569_v29  ;;  %v447_v44 = vmul.f32 %v793_v32, %v1272_v49  ;;  %816 = vrsqrt.f32 %v1363_v16  ;;  %vm497_vm1 = vcmp.eq.f32.partialorder %v1351_v11, inf  ;;  %v500_v61 = vand.u32 2147483648, %v1351_v11 }
  0xe7   : > { %v797_v6 = vpop.eup %796  ;;  %614 = vst.msk [vmem:[%s1154_s14 + $0x80] sm:$0xff] %vm181_vm0, %v567_v14  ;;  %v573_v46 = vmul.f32 %v795_v56, %v977_v52  ;;  %818 = vrcp.f32 %v527_v33  ;;  %v472_v52 = vand.u32 2147483648, %v1290_v60  ;;  %vm499_vm2 = vcmp.eq.f32.partialorder %v1351_v11, 0.0 }
  0xe8   : > { %v799_v36 = vpop.eup %798  ;;  %v449_v34 = vsel %vm448_vm6, %v1272_v49, %v447_v44  ;;  %v468_v37 = vmul.f32 %v797_v6, %v1290_v60  ;;  %vm490_vm3 = vcmp.eq.f32.partialorder %v1363_v16, inf  ;;  %v493_v32 = vand.u32 2147483648, %v1363_v16 }
  0xe9   : > { %v801_v42 = vpop.eup %800  ;;  %617 = vst.msk [vmem:[%s1154_s14 + $0x98] sm:$0xff] %vm181_vm0, %v573_v46  ;;  %v452_v43 = vsel %vm450_vm7, %v451_v47, %v449_v34  ;;  %v461_v48 = vmul.f32 %v799_v36, %v1307_v27  ;;  %vm492_vm4 = vcmp.eq.f32.partialorder %v1363_v16, 0.0 }
  0xea   : > { %v803_v51 = vpop.eup %802  ;;  %v571_v49 = vmul.f32 %v801_v42, %v980_v53  ;;  %v526_v2 = vmax.f32 %v452_v43, 1e-12  ;;  %v470_v23 = vsel %vm469_vm8, %v1290_v60, %v468_v37 }
  0xeb   : > { %v805_v50 = vpop.eup %804  ;;  %v577_v15 = vmul.f32 %v803_v51, %v989_v58  ;;  %v473_v8 = vsel %vm471_vm9, %v472_v52, %v470_v23  ;;  %v463_v1 = vsel %vm462_vm10, %v1307_v27, %v461_v48  ;;  %v486_v58 = vand.u32 2147483648, %v1323_v22 }
  0xec   : > { %616 = vst.msk [vmem:[%s1154_s14 + $0x90] sm:$0xff] %vm181_vm0, %v571_v49  ;;  %820 = vrcp.f32 %v526_v2  ;;  %v529_v9 = vmax.f32 %v473_v8, 1e-12  ;;  %v466_v35 = vsel %vm464_vm11, %v465_v57, %v463_v1  ;;  %v482_v53 = vmul.f32 %v805_v50, %v1323_v22  ;;  %v807_v45 = vpop.eup %806 }
  0xed   : > { %619 = vst.msk [vmem:[%s1154_s14 + $0xa8] sm:$0xff] %vm181_vm0, %v577_v15  ;;  %v528_v60 = vmax.f32 %v466_v35, 1e-12  ;;  %v809_v40 = vpop.eup %808  ;;  %v575_v54 = vmul.f32 %v807_v45, %v992_v59 }
  0xee   : > { %822 = vrcp.f32 %v529_v9  ;;  %v484_v27 = vsel %vm483_vm12, %v1323_v22, %v482_v53  ;;  %v475_v5 = vmul.f32 %v809_v40, %v1333_v0  ;;  %v811_v7 = vpop.eup %810 }
  0xef   : > { %824 = vrcp.f32 %v528_v60  ;;  %v487_v63 = vsel %vm485_vm13, %v486_v58, %v484_v27  ;;  %618 = vst.msk [vmem:[%s1154_s14 + $0xa0] sm:$0xff] %vm181_vm0, %v575_v54  ;;  %v496_v22 = vmul.f32 %v811_v7, %v1351_v11 }
  0xf0   : > { %v531_v10 = vmax.f32 %v487_v63, 1e-12  ;;  %v477_v59 = vsel %vm476_vm14, %v1333_v0, %v475_v5 }
  0xf1   : > { %v813_v24 = vpop.eup %812  ;;  %v480_v41 = vsel %vm478_vm15, %v479_v18, %v477_v59  ;;  %v498_v17 = vsel %vm497_vm1, %v1351_v11, %v496_v22 }
  0xf2   : > { %v815_v55 = vpop.eup %814  ;;  %v581_v28 = vmul.f32 %v813_v24, %v1001_v3  ;;  %826 = vrcp.f32 %v531_v10  ;;  %v530_v26 = vmax.f32 %v480_v41, 1e-12  ;;  %v501_v29 = vsel %vm499_vm2, %v500_v61, %v498_v17 }
  0xf3   : > { %v817_v62 = vpop.eup %816  ;;  %v579_v25 = vmul.f32 %v815_v55, %v1004_v4  ;;  %v533_v4 = vmax.f32 %v501_v29, 1e-12 }
  0xf4   : > { %v819_v0 = vpop.eup %818  ;;  %621 = vst.msk [vmem:[%s1154_s14 + $0xb8] sm:$0xff] %vm181_vm0, %v581_v28  ;;  %v489_v19 = vmul.f32 %v817_v62, %v1363_v16  ;;  %828 = vrcp.f32 %v530_v26 }
  0xf5   : > { %620 = vst.msk [vmem:[%s1154_s14 + $0xb0] sm:$0xff] %vm181_vm0, %v579_v25  ;;  %v585_v3 = vmul.f32 %v819_v0, %v1013_v12  ;;  %830 = vrcp.f32 %v533_v4 }
  0xf6   : > { %v491_v11 = vsel %vm490_vm3, %v1363_v16, %v489_v19 }
  0xf7   : > { %623 = vst.msk [vmem:[%s1154_s14 + $0xc8] sm:$0xff] %vm181_vm0, %v585_v3  ;;  %v494_v14 = vsel %vm492_vm4, %v493_v32, %v491_v11 }
  0xf8   : > { %v532_v33 = vmax.f32 %v494_v14, 1e-12 }
  0xf9   : > { %v821_v56 = vpop.eup %820 }
  0xfa   : > { %v583_v12 = vmul.f32 %v821_v56, %v1016_v13  ;;  %832 = vrcp.f32 %v532_v33 }
  0xfb   : > { %v823_v44 = vpop.eup %822 }
  0xfc   : > { %v825_v6 = vpop.eup %824  ;;  %622 = vst.msk [vmem:[%s1154_s14 + $0xc0] sm:$0xff] %vm181_vm0, %v583_v12  ;;  %v589_v46 = vmul.f32 %v823_v44, %v1025_v20 }
  0xfd   : > { %v587_v16 = vmul.f32 %v825_v6, %v1028_v21 }
  0xfe   : > { %625 = vst.msk [vmem:[%s1154_s14 + $0xd8] sm:$0xff] %vm181_vm0, %v589_v46 }
  0xff   : > { %v827_v47 = vpop.eup %826  ;;  %624 = vst.msk [vmem:[%s1154_s14 + $0xd0] sm:$0xff] %vm181_vm0, %v587_v16 }
 0x100   : > { %v593_v36 = vmul.f32 %v827_v47, %v1037_v30 }
 0x101   : > { %v829_v34 = vpop.eup %828 }
 0x102   : > { %627 = vst.msk [vmem:[%s1154_s14 + $0xe8] sm:$0xff] %vm181_vm0, %v593_v36  ;;  %v591_v13 = vmul.f32 %v829_v34, %v1040_v31  ;;  %v831_v37 = vpop.eup %830 }
 0x103   : > { %v597_v42 = vmul.f32 %v831_v37, %v1049_v38 }
 0x104   : > { %626 = vst.msk [vmem:[%s1154_s14 + $0xe0] sm:$0xff] %vm181_vm0, %v591_v13 }
 0x105   : > { %629 = vst.msk [vmem:[%s1154_s14 + $0xf8] sm:$0xff] %vm181_vm0, %v597_v42 }
 0x107   : > { %v833_v20 = vpop.eup %832 }
 0x108   : > { %v595_v21 = vmul.f32 %v833_v20, %v1052_v39 }
 0x10a   : > { %628 = vst.msk [vmem:[%s1154_s14 + $0xf0] sm:$0xff] %vm181_vm0, %v595_v21 }
 0x10b PF: > { %s11_s6 = sadd.s32 1, %s840_s6  }
 0x10c   : > { %p8_p4 = scmp.ge.s32.totalorder %s11_s6, 4  }
 0x10e   :  { %10 = sbr.rel (!%p8_p4) target bundleno = 1 (0x1), region = 54 }

</bundles_post_ra>
